<compile_context>
chip_gen: v5e
topology: v5e:2x2
jax: 0.10.0
libtpu: 0.0.40
codegen_flags: <defaults>
</compile_context>

<pallas_src>
import math

import jax
import jax.numpy as jnp
from jax.experimental import pallas as pl
from jax.experimental.pallas import tpu as pltpu


def _make_kernel(num_layers, seq_len, batch_padded, batch, hidden_size):
    """Kernel closed over static num_layers / seq_len / padded+real batch / hidden."""
    T, Bp, B, H = seq_len, batch_padded, batch, hidden_size

    def kernel(*refs):
        x_ref = refs[0]                                   # (T*Bp, I) time-major blocks
        wih0_ref, whh0_ref, b0_ref = refs[1:4]
        upper = refs[4:4 + 3 * (num_layers - 1)]
        wfc_ref = refs[4 + 3 * (num_layers - 1)]
        bfc_ref = refs[5 + 3 * (num_layers - 1)]
        out_ref = refs[6 + 3 * (num_layers - 1)]

        # Weight / bias loads hoisted out of the time loop.  Safe while the f32
        # weights fit comfortably in the 64 x 4 KiB vreg file (small H); for
        # H >= ~128 index the refs inside the loop instead (in-loop VMEM vld is
        # essentially free here, vreg spills are not).
        wih0 = wih0_ref[...]                              # (I, H)
        whh0 = whh0_ref[...]                              # (H, H)
        b0 = b0_ref[...]                                  # (1, H)  = bih0 + bhh0
        w_ih_up = [upper[3 * i][...] for i in range(num_layers - 1)]      # (H, H)
        w_hh_up = [upper[3 * i + 1][...] for i in range(num_layers - 1)]  # (H, H)
        b_up = [upper[3 * i + 2][...] for i in range(num_layers - 1)]     # (1, H)
        wfc = wfc_ref[...]                                # (H, output_size)
        bfc = bfc_ref[...]                                # (1, output_size)

        # Layer-0 input projection for ALL timesteps in one matmul, off the
        # serial recurrence chain (bias pre-summed in the wrapper).
        x_proj = jnp.dot(x_ref[...], wih0,
                         preferred_element_type=jnp.float32) + b0          # (T*Bp, H)

        hs = [None] * num_layers    # h_t per layer
        hh = [None] * num_layers    # h_{t-1} @ W_hh, produced one timestep early

        # Fully unrolled: at T=8 the working set is a few KiB and unrolling gives
        # the LLO scheduler full visibility.  For T >~ 16 switch to
        # lax.fori_loop(..., unroll=2..4) carrying hs/hh to bound live ranges.
        for t in range(T):
            # Tile-aligned slice: Bp is a multiple of 8 sublanes, so this is free.
            xp_t = x_proj[t * Bp:(t + 1) * Bp, :]         # (Bp, H)
            if t == 0:
                hs[0] = jnp.tanh(xp_t)                    # h_{-1} == 0 -> skip hh term
            else:
                hs[0] = jnp.tanh(xp_t + hh[0])
            if t + 1 < T:
                # Recurrent product for the NEXT timestep, issued as soon as hs[0]
                # exists: it runs off the layer-(l+1) critical path.
                hh[0] = jnp.dot(hs[0], whh0, preferred_element_type=jnp.float32)
            inp = hs[0]
            for l in range(1, num_layers):
                ih = jnp.dot(inp, w_ih_up[l - 1],
                             preferred_element_type=jnp.float32) + b_up[l - 1]
                if t == 0:
                    hs[l] = jnp.tanh(ih)                  # zero initial hidden state
                else:
                    hs[l] = jnp.tanh(ih + hh[l])
                if t + 1 < T:
                    hh[l] = jnp.dot(hs[l], w_hh_up[l - 1],
                                    preferred_element_type=jnp.float32)
                inp = hs[l]

        # p = out[:, -1, :] == last-timestep hidden state of the top layer.
        p = hs[num_layers - 1]                            # (Bp, H)
        y = jnp.dot(p, wfc, preferred_element_type=jnp.float32) + bfc

        # Per-column clamp: dl (col 2) -> [0, 1], others -> [-1, 1].
        y5 = y[:, 0:5]
        col = jax.lax.broadcasted_iota(jnp.int32, y5.shape, 1)
        lower = jnp.where(col == 2, 0.0, -1.0)
        du = jnp.clip(y5, lower, 1.0)
        out_ref[...] = du[:B, :].astype(out_ref.dtype)    # drop padded batch rows

    return kernel


def rnn_policy_forward(x, params):
    """x: (B, T, input_size) float32. Returns du: (B, 5) float32."""
    num_layers = params["num_layers"]
    hidden_size = params["hidden_size"]
    B, T, I = x.shape
    Bp = max(8, -(-B // 8) * 8)   # pad batch rows to a full 8-sublane f32 tile

    # Time-major + sublane-padded so each per-timestep row block of x_proj is a
    # whole (8,*)-aligned tile; the per-step slice inside the kernel is then free.
    # (For very long T*B this buffer should instead be chunk-pipelined from HBM.)
    x_tm = jnp.transpose(x, (1, 0, 2))                            # (T, B, I)
    x_tm = jnp.pad(x_tm, ((0, 0), (0, Bp - B), (0, 0)))           # (T, Bp, I)
    x2d = x_tm.reshape(T * Bp, I)

    inputs = [
        x2d,
        params["wih0T"],                                          # (I, H)
        params["whh0T"],                                          # (H, H)
        (params["bih0"] + params["bhh0"]).reshape(1, -1),         # (1, H)
    ]
    for l in range(1, num_layers):
        inputs += [
            params[f"wih{l}T"],                                   # (H, H)
            params[f"whh{l}T"],                                   # (H, H)
            (params[f"bih{l}"] + params[f"bhh{l}"]).reshape(1, -1),
        ]
    inputs += [params["wfcT"], params["bfc"].reshape(1, -1)]

    kernel = _make_kernel(num_layers, T, Bp, B, hidden_size)
    return pl.pallas_call(
        kernel,
        out_shape=jax.ShapeDtypeStruct((B, 5), jnp.float32),
        in_specs=[pl.BlockSpec(memory_space=pltpu.MemorySpace.VMEM)] * len(inputs),
        out_specs=pl.BlockSpec(memory_space=pltpu.MemorySpace.VMEM),
    )(*inputs)


def init_params(key, input_size, hidden_size, num_layers, output_size):
    """Deterministic init mimicking PyTorch's uniform(-1/sqrt(H), 1/sqrt(H))."""
    params = {"num_layers": num_layers, "hidden_size": hidden_size,
              "output_size": output_size}
    k = 1.0 / math.sqrt(hidden_size)
    for l in range(num_layers):
        in_feat = input_size if l == 0 else hidden_size
        key, k1, k2, k3, k4 = jax.random.split(key, 5)
        # Stored pre-transposed: (in_features, H) and (H, H).
        params[f"wih{l}T"] = jax.random.uniform(k1, (in_feat, hidden_size),
                                                jnp.float32, -k, k)
        params[f"whh{l}T"] = jax.random.uniform(k2, (hidden_size, hidden_size),
                                                jnp.float32, -k, k)
        params[f"bih{l}"] = jax.random.uniform(k3, (hidden_size,), jnp.float32, -k, k)
        params[f"bhh{l}"] = jax.random.uniform(k4, (hidden_size,), jnp.float32, -k, k)
    key, k1, k2 = jax.random.split(key, 3)
    params["wfcT"] = jax.random.uniform(k1, (hidden_size, output_size),
                                        jnp.float32, -k, k)
    params["bfc"] = jax.random.uniform(k2, (output_size,), jnp.float32, -k, k)
    return params


def rnn_policy_reference(x, params):
    """Pure-JAX reference of the torch forward pass, for verification."""
    num_layers = params["num_layers"]
    hidden_size = params["hidden_size"]
    B, T, _ = x.shape
    hs = [jnp.zeros((B, hidden_size), jnp.float32) for _ in range(num_layers)]
    for t in range(T):
        inp = x[:, t, :]
        for l in range(num_layers):
            pre = (inp @ params[f"wih{l}T"] + params[f"bih{l}"]
                   + hs[l] @ params[f"whh{l}T"] + params[f"bhh{l}"])
            hs[l] = jnp.tanh(pre)
            inp = hs[l]
    y = hs[-1] @ params["wfcT"] + params["bfc"]
    dt3 = jnp.clip(y[:, 0:1], -1.0, 1.0)
    dt4 = jnp.clip(y[:, 1:2], -1.0, 1.0)
    dl = jnp.clip(y[:, 2:3], 0.0, 1.0)
    db = jnp.clip(y[:, 3:4], -1.0, 1.0)
    dr = jnp.clip(y[:, 4:5], -1.0, 1.0)
    return jnp.concatenate([dt3, dt4, dl, db, dr], axis=1)


if __name__ == "__main__":
    # Small shapes consistent with the module: output_size must be a multiple of 5.
    input_size, hidden_size, num_layers, output_size = 16, 32, 2, 10
    batch, seq = 2, 8

    key = jax.random.PRNGKey(0)
    key, xkey = jax.random.split(key)
    x = jax.random.normal(xkey, (batch, seq, input_size), jnp.float32)
    params = init_params(key, input_size, hidden_size, num_layers, output_size)

    du = rnn_policy_forward(x, params)
    du = jax.block_until_ready(du)

    du_ref = rnn_policy_reference(x, params)
    assert du.shape == (batch, 5), du.shape
    assert jnp.allclose(du, du_ref, atol=1e-5, rtol=1e-5), (du, du_ref)

    print("KERNEL_OK")
</pallas_src>

<mosaic_0001>
module attributes {stable_mosaic.version = 11 : i64} {
  func.func @kernel(%arg0: memref<64x16xf32, #tpu.memory_space<vmem>>, %arg1: memref<16x32xf32, #tpu.memory_space<vmem>>, %arg2: memref<32x32xf32, #tpu.memory_space<vmem>>, %arg3: memref<1x32xf32, #tpu.memory_space<vmem>>, %arg4: memref<32x32xf32, #tpu.memory_space<vmem>>, %arg5: memref<32x32xf32, #tpu.memory_space<vmem>>, %arg6: memref<1x32xf32, #tpu.memory_space<vmem>>, %arg7: memref<32x10xf32, #tpu.memory_space<vmem>>, %arg8: memref<1x10xf32, #tpu.memory_space<vmem>>, %arg9: memref<2x5xf32, #tpu.memory_space<vmem>>) attributes {dimension_semantics = [], scalar_prefetch = 0 : i64, scratch_operands = 0 : i64, tpu.core_type = #tpu.core_type<tc>} {
    %c0 = arith.constant 0 : index
    %c0_0 = arith.constant 0 : index
    %0 = vector.load %arg1[%c0, %c0_0] : memref<16x32xf32, #tpu.memory_space<vmem>>, vector<16x32xf32>
    %c0_1 = arith.constant 0 : index
    %c0_2 = arith.constant 0 : index
    %1 = vector.load %arg2[%c0_1, %c0_2] : memref<32x32xf32, #tpu.memory_space<vmem>>, vector<32x32xf32>
    %c0_3 = arith.constant 0 : index
    %c0_4 = arith.constant 0 : index
    %2 = vector.load %arg3[%c0_3, %c0_4] : memref<1x32xf32, #tpu.memory_space<vmem>>, vector<1x32xf32>
    %c0_5 = arith.constant 0 : index
    %c0_6 = arith.constant 0 : index
    %3 = vector.load %arg4[%c0_5, %c0_6] : memref<32x32xf32, #tpu.memory_space<vmem>>, vector<32x32xf32>
    %c0_7 = arith.constant 0 : index
    %c0_8 = arith.constant 0 : index
    %4 = vector.load %arg5[%c0_7, %c0_8] : memref<32x32xf32, #tpu.memory_space<vmem>>, vector<32x32xf32>
    %c0_9 = arith.constant 0 : index
    %c0_10 = arith.constant 0 : index
    %5 = vector.load %arg6[%c0_9, %c0_10] : memref<1x32xf32, #tpu.memory_space<vmem>>, vector<1x32xf32>
    %c0_11 = arith.constant 0 : index
    %c0_12 = arith.constant 0 : index
    %6 = vector.load %arg7[%c0_11, %c0_12] : memref<32x10xf32, #tpu.memory_space<vmem>>, vector<32x10xf32>
    %c0_13 = arith.constant 0 : index
    %c0_14 = arith.constant 0 : index
    %7 = vector.load %arg8[%c0_13, %c0_14] : memref<1x10xf32, #tpu.memory_space<vmem>>, vector<1x10xf32>
    %c0_15 = arith.constant 0 : index
    %c0_16 = arith.constant 0 : index
    %8 = vector.load %arg0[%c0_15, %c0_16] : memref<64x16xf32, #tpu.memory_space<vmem>>, vector<64x16xf32>
    %cst = arith.constant dense<0.000000e+00> : vector<64x32xf32>
    %9 = tpu.matmul %8, %0, %cst {dimension_numbers = #tpu.dot_dimension_numbers<[1], [0], [0], [1], [0, 0, 1, 1], [], []>} : vector<64x16xf32>, vector<16x32xf32>, vector<64x32xf32> -> vector<64x32xf32>
    %10 = vector.broadcast %2 : vector<1x32xf32> to vector<64x32xf32>
    %11 = arith.addf %9, %10 : vector<64x32xf32>
    %12 = vector.extract_strided_slice %11 {offsets = [0, 0], sizes = [8, 32], strides = [1, 1]} : vector<64x32xf32> to vector<8x32xf32>
    %13 = math.tanh %12 : vector<8x32xf32>
    %cst_17 = arith.constant dense<0.000000e+00> : vector<8x32xf32>
    %14 = tpu.matmul %13, %1, %cst_17 {dimension_numbers = #tpu.dot_dimension_numbers<[1], [0], [0], [1], [0, 0, 1, 1], [], []>} : vector<8x32xf32>, vector<32x32xf32>, vector<8x32xf32> -> vector<8x32xf32>
    %cst_18 = arith.constant dense<0.000000e+00> : vector<8x32xf32>
    %15 = tpu.matmul %13, %3, %cst_18 {dimension_numbers = #tpu.dot_dimension_numbers<[1], [0], [0], [1], [0, 0, 1, 1], [], []>} : vector<8x32xf32>, vector<32x32xf32>, vector<8x32xf32> -> vector<8x32xf32>
    %16 = vector.broadcast %5 : vector<1x32xf32> to vector<8x32xf32>
    %17 = arith.addf %15, %16 : vector<8x32xf32>
    %18 = math.tanh %17 : vector<8x32xf32>
    %cst_19 = arith.constant dense<0.000000e+00> : vector<8x32xf32>
    %19 = tpu.matmul %18, %4, %cst_19 {dimension_numbers = #tpu.dot_dimension_numbers<[1], [0], [0], [1], [0, 0, 1, 1], [], []>} : vector<8x32xf32>, vector<32x32xf32>, vector<8x32xf32> -> vector<8x32xf32>
    %20 = vector.extract_strided_slice %11 {offsets = [8, 0], sizes = [8, 32], strides = [1, 1]} : vector<64x32xf32> to vector<8x32xf32>
    %21 = arith.addf %20, %14 : vector<8x32xf32>
    %22 = math.tanh %21 : vector<8x32xf32>
    %cst_20 = arith.constant dense<0.000000e+00> : vector<8x32xf32>
    %23 = tpu.matmul %22, %1, %cst_20 {dimension_numbers = #tpu.dot_dimension_numbers<[1], [0], [0], [1], [0, 0, 1, 1], [], []>} : vector<8x32xf32>, vector<32x32xf32>, vector<8x32xf32> -> vector<8x32xf32>
    %cst_21 = arith.constant dense<0.000000e+00> : vector<8x32xf32>
    %24 = tpu.matmul %22, %3, %cst_21 {dimension_numbers = #tpu.dot_dimension_numbers<[1], [0], [0], [1], [0, 0, 1, 1], [], []>} : vector<8x32xf32>, vector<32x32xf32>, vector<8x32xf32> -> vector<8x32xf32>
    %25 = vector.broadcast %5 : vector<1x32xf32> to vector<8x32xf32>
    %26 = arith.addf %24, %25 : vector<8x32xf32>
    %27 = arith.addf %26, %19 : vector<8x32xf32>
    %28 = math.tanh %27 : vector<8x32xf32>
    %cst_22 = arith.constant dense<0.000000e+00> : vector<8x32xf32>
    %29 = tpu.matmul %28, %4, %cst_22 {dimension_numbers = #tpu.dot_dimension_numbers<[1], [0], [0], [1], [0, 0, 1, 1], [], []>} : vector<8x32xf32>, vector<32x32xf32>, vector<8x32xf32> -> vector<8x32xf32>
    %30 = vector.extract_strided_slice %11 {offsets = [16, 0], sizes = [8, 32], strides = [1, 1]} : vector<64x32xf32> to vector<8x32xf32>
    %31 = arith.addf %30, %23 : vector<8x32xf32>
    %32 = math.tanh %31 : vector<8x32xf32>
    %cst_23 = arith.constant dense<0.000000e+00> : vector<8x32xf32>
    %33 = tpu.matmul %32, %1, %cst_23 {dimension_numbers = #tpu.dot_dimension_numbers<[1], [0], [0], [1], [0, 0, 1, 1], [], []>} : vector<8x32xf32>, vector<32x32xf32>, vector<8x32xf32> -> vector<8x32xf32>
    %cst_24 = arith.constant dense<0.000000e+00> : vector<8x32xf32>
    %34 = tpu.matmul %32, %3, %cst_24 {dimension_numbers = #tpu.dot_dimension_numbers<[1], [0], [0], [1], [0, 0, 1, 1], [], []>} : vector<8x32xf32>, vector<32x32xf32>, vector<8x32xf32> -> vector<8x32xf32>
    %35 = vector.broadcast %5 : vector<1x32xf32> to vector<8x32xf32>
    %36 = arith.addf %34, %35 : vector<8x32xf32>
    %37 = arith.addf %36, %29 : vector<8x32xf32>
    %38 = math.tanh %37 : vector<8x32xf32>
    %cst_25 = arith.constant dense<0.000000e+00> : vector<8x32xf32>
    %39 = tpu.matmul %38, %4, %cst_25 {dimension_numbers = #tpu.dot_dimension_numbers<[1], [0], [0], [1], [0, 0, 1, 1], [], []>} : vector<8x32xf32>, vector<32x32xf32>, vector<8x32xf32> -> vector<8x32xf32>
    %40 = vector.extract_strided_slice %11 {offsets = [24, 0], sizes = [8, 32], strides = [1, 1]} : vector<64x32xf32> to vector<8x32xf32>
    %41 = arith.addf %40, %33 : vector<8x32xf32>
    %42 = math.tanh %41 : vector<8x32xf32>
    %cst_26 = arith.constant dense<0.000000e+00> : vector<8x32xf32>
    %43 = tpu.matmul %42, %1, %cst_26 {dimension_numbers = #tpu.dot_dimension_numbers<[1], [0], [0], [1], [0, 0, 1, 1], [], []>} : vector<8x32xf32>, vector<32x32xf32>, vector<8x32xf32> -> vector<8x32xf32>
    %cst_27 = arith.constant dense<0.000000e+00> : vector<8x32xf32>
    %44 = tpu.matmul %42, %3, %cst_27 {dimension_numbers = #tpu.dot_dimension_numbers<[1], [0], [0], [1], [0, 0, 1, 1], [], []>} : vector<8x32xf32>, vector<32x32xf32>, vector<8x32xf32> -> vector<8x32xf32>
    %45 = vector.broadcast %5 : vector<1x32xf32> to vector<8x32xf32>
    %46 = arith.addf %44, %45 : vector<8x32xf32>
    %47 = arith.addf %46, %39 : vector<8x32xf32>
    %48 = math.tanh %47 : vector<8x32xf32>
    %cst_28 = arith.constant dense<0.000000e+00> : vector<8x32xf32>
    %49 = tpu.matmul %48, %4, %cst_28 {dimension_numbers = #tpu.dot_dimension_numbers<[1], [0], [0], [1], [0, 0, 1, 1], [], []>} : vector<8x32xf32>, vector<32x32xf32>, vector<8x32xf32> -> vector<8x32xf32>
    %50 = vector.extract_strided_slice %11 {offsets = [32, 0], sizes = [8, 32], strides = [1, 1]} : vector<64x32xf32> to vector<8x32xf32>
    %51 = arith.addf %50, %43 : vector<8x32xf32>
    %52 = math.tanh %51 : vector<8x32xf32>
    %cst_29 = arith.constant dense<0.000000e+00> : vector<8x32xf32>
    %53 = tpu.matmul %52, %1, %cst_29 {dimension_numbers = #tpu.dot_dimension_numbers<[1], [0], [0], [1], [0, 0, 1, 1], [], []>} : vector<8x32xf32>, vector<32x32xf32>, vector<8x32xf32> -> vector<8x32xf32>
    %cst_30 = arith.constant dense<0.000000e+00> : vector<8x32xf32>
    %54 = tpu.matmul %52, %3, %cst_30 {dimension_numbers = #tpu.dot_dimension_numbers<[1], [0], [0], [1], [0, 0, 1, 1], [], []>} : vector<8x32xf32>, vector<32x32xf32>, vector<8x32xf32> -> vector<8x32xf32>
    %55 = vector.broadcast %5 : vector<1x32xf32> to vector<8x32xf32>
    %56 = arith.addf %54, %55 : vector<8x32xf32>
    %57 = arith.addf %56, %49 : vector<8x32xf32>
    %58 = math.tanh %57 : vector<8x32xf32>
    %cst_31 = arith.constant dense<0.000000e+00> : vector<8x32xf32>
    %59 = tpu.matmul %58, %4, %cst_31 {dimension_numbers = #tpu.dot_dimension_numbers<[1], [0], [0], [1], [0, 0, 1, 1], [], []>} : vector<8x32xf32>, vector<32x32xf32>, vector<8x32xf32> -> vector<8x32xf32>
    %60 = vector.extract_strided_slice %11 {offsets = [40, 0], sizes = [8, 32], strides = [1, 1]} : vector<64x32xf32> to vector<8x32xf32>
    %61 = arith.addf %60, %53 : vector<8x32xf32>
    %62 = math.tanh %61 : vector<8x32xf32>
    %cst_32 = arith.constant dense<0.000000e+00> : vector<8x32xf32>
    %63 = tpu.matmul %62, %1, %cst_32 {dimension_numbers = #tpu.dot_dimension_numbers<[1], [0], [0], [1], [0, 0, 1, 1], [], []>} : vector<8x32xf32>, vector<32x32xf32>, vector<8x32xf32> -> vector<8x32xf32>
    %cst_33 = arith.constant dense<0.000000e+00> : vector<8x32xf32>
    %64 = tpu.matmul %62, %3, %cst_33 {dimension_numbers = #tpu.dot_dimension_numbers<[1], [0], [0], [1], [0, 0, 1, 1], [], []>} : vector<8x32xf32>, vector<32x32xf32>, vector<8x32xf32> -> vector<8x32xf32>
    %65 = vector.broadcast %5 : vector<1x32xf32> to vector<8x32xf32>
    %66 = arith.addf %64, %65 : vector<8x32xf32>
    %67 = arith.addf %66, %59 : vector<8x32xf32>
    %68 = math.tanh %67 : vector<8x32xf32>
    %cst_34 = arith.constant dense<0.000000e+00> : vector<8x32xf32>
    %69 = tpu.matmul %68, %4, %cst_34 {dimension_numbers = #tpu.dot_dimension_numbers<[1], [0], [0], [1], [0, 0, 1, 1], [], []>} : vector<8x32xf32>, vector<32x32xf32>, vector<8x32xf32> -> vector<8x32xf32>
    %70 = vector.extract_strided_slice %11 {offsets = [48, 0], sizes = [8, 32], strides = [1, 1]} : vector<64x32xf32> to vector<8x32xf32>
    %71 = arith.addf %70, %63 : vector<8x32xf32>
    %72 = math.tanh %71 : vector<8x32xf32>
    %cst_35 = arith.constant dense<0.000000e+00> : vector<8x32xf32>
    %73 = tpu.matmul %72, %1, %cst_35 {dimension_numbers = #tpu.dot_dimension_numbers<[1], [0], [0], [1], [0, 0, 1, 1], [], []>} : vector<8x32xf32>, vector<32x32xf32>, vector<8x32xf32> -> vector<8x32xf32>
    %cst_36 = arith.constant dense<0.000000e+00> : vector<8x32xf32>
    %74 = tpu.matmul %72, %3, %cst_36 {dimension_numbers = #tpu.dot_dimension_numbers<[1], [0], [0], [1], [0, 0, 1, 1], [], []>} : vector<8x32xf32>, vector<32x32xf32>, vector<8x32xf32> -> vector<8x32xf32>
    %75 = vector.broadcast %5 : vector<1x32xf32> to vector<8x32xf32>
    %76 = arith.addf %74, %75 : vector<8x32xf32>
    %77 = arith.addf %76, %69 : vector<8x32xf32>
    %78 = math.tanh %77 : vector<8x32xf32>
    %cst_37 = arith.constant dense<0.000000e+00> : vector<8x32xf32>
    %79 = tpu.matmul %78, %4, %cst_37 {dimension_numbers = #tpu.dot_dimension_numbers<[1], [0], [0], [1], [0, 0, 1, 1], [], []>} : vector<8x32xf32>, vector<32x32xf32>, vector<8x32xf32> -> vector<8x32xf32>
    %80 = vector.extract_strided_slice %11 {offsets = [56, 0], sizes = [8, 32], strides = [1, 1]} : vector<64x32xf32> to vector<8x32xf32>
    %81 = arith.addf %80, %73 : vector<8x32xf32>
    %82 = math.tanh %81 : vector<8x32xf32>
    %cst_38 = arith.constant dense<0.000000e+00> : vector<8x32xf32>
    %83 = tpu.matmul %82, %3, %cst_38 {dimension_numbers = #tpu.dot_dimension_numbers<[1], [0], [0], [1], [0, 0, 1, 1], [], []>} : vector<8x32xf32>, vector<32x32xf32>, vector<8x32xf32> -> vector<8x32xf32>
    %84 = vector.broadcast %5 : vector<1x32xf32> to vector<8x32xf32>
    %85 = arith.addf %83, %84 : vector<8x32xf32>
    %86 = arith.addf %85, %79 : vector<8x32xf32>
    %87 = math.tanh %86 : vector<8x32xf32>
    %cst_39 = arith.constant dense<0.000000e+00> : vector<8x10xf32>
    %88 = tpu.matmul %87, %6, %cst_39 {dimension_numbers = #tpu.dot_dimension_numbers<[1], [0], [0], [1], [0, 0, 1, 1], [], []>} : vector<8x32xf32>, vector<32x10xf32>, vector<8x10xf32> -> vector<8x10xf32>
    %89 = vector.broadcast %7 : vector<1x10xf32> to vector<8x10xf32>
    %90 = arith.addf %88, %89 : vector<8x10xf32>
    %91 = vector.extract_strided_slice %90 {offsets = [0, 0], sizes = [8, 5], strides = [1, 1]} : vector<8x10xf32> to vector<8x5xf32>
    %92 = tpu.iota {dimensions = array<i32: 1>} : vector<8x5xi32>
    %c2_i32 = arith.constant 2 : i32
    %93 = vector.broadcast %c2_i32 : i32 to vector<8x5xi32>
    %94 = arith.cmpi eq, %92, %93 : vector<8x5xi32>
    %cst_40 = arith.constant 0.000000e+00 : f32
    %cst_41 = arith.constant -1.000000e+00 : f32
    %95 = vector.broadcast %cst_40 : f32 to vector<8x5xf32>
    %96 = vector.broadcast %cst_41 : f32 to vector<8x5xf32>
    %97 = arith.select %94, %95, %96 : vector<8x5xi1>, vector<8x5xf32>
    %cst_42 = arith.constant 1.000000e+00 : f32
    %98 = arith.maximumf %97, %91 : vector<8x5xf32>
    %99 = vector.broadcast %cst_42 : f32 to vector<8x5xf32>
    %100 = arith.minimumf %99, %98 : vector<8x5xf32>
    %101 = vector.extract_strided_slice %100 {offsets = [0, 0], sizes = [2, 5], strides = [1, 1]} : vector<8x5xf32> to vector<2x5xf32>
    %c0_43 = arith.constant 0 : index
    %c0_44 = arith.constant 0 : index
    %102 = vector.load %arg9[%c0_43, %c0_44] : memref<2x5xf32, #tpu.memory_space<vmem>>, vector<2x5xf32>
    tpu.vector_store %arg9[%c0_43, %c0_44], %101 {strides = array<i32>} : memref<2x5xf32, #tpu.memory_space<vmem>>, vector<2x5xf32>,
    return
  }
}

</mosaic_0001>

<bundles_post_ra>
// kernel: tpu_custom_call.1
= control target key start
LH: loop header
LB: loop body
LE: loop exit
PB: predicated region body
PF: predicated region fallthrough
CT: control target
= control target key end

     0   :  { %vm65_vm0 = vcmask 130048   ;;  %s1099_s0 = inlined_call_operand.vmem [shape: f32[64,16], index: 0, kind: input, shape index: {}]   ;;  %s1100_s1 = inlined_call_operand.vmem [shape: f32[16,32], index: 1, kind: input, shape index: {}]   ;;  %s1101_s2 = inlined_call_operand.vmem [shape: f32[32,32], index: 2, kind: input, shape index: {}]   ;;  %s1102_s3 = inlined_call_operand.vmem [shape: f32[1,32], index: 3, kind: input, shape index: {}]   ;;  %s1103_s4 = inlined_call_operand.vmem [shape: f32[32,32], index: 4, kind: input, shape index: {}]   ;;  %s1104_s5 = inlined_call_operand.vmem [shape: f32[32,32], index: 5, kind: input, shape index: {}]   ;;  %s1105_s6 = inlined_call_operand.vmem [shape: f32[1,32], index: 6, kind: input, shape index: {}]   ;;  %s1106_s7 = inlined_call_operand.vmem [shape: f32[32,10], index: 7, kind: input, shape index: {}]   ;;  %s1107_s8 = inlined_call_operand.vmem [shape: f32[1,10], index: 8, kind: input, shape index: {}]   ;;  %s1108_s9 = inlined_call_operand.hbm [shape: f32[2,5], index: 9, kind: output, shape index: {}]  }
   0x1   :  { %v34_v0 = vld [vmem:[%s1100_s1 + $0x8] sm:$0xff]  ;;  %v33_v1 = vld [vmem:[%s1100_s1] sm:$0xff] }
   0x2   :  { %104 = vmatpush.msra.mxu0 %v34_v0  ;;  %v54_v2 = vld [vmem:[%s1099_s0] sm:$0xff] }
   0x3   :  { %14 = vsyncpa [#allocation3], 0  ;;  %v859_v3 = vld [vmem:[%s1101_s2 + $0x18] sm:$0xff]  ;;  %v871_v5 = vld [vmem:[%s1101_s2 + $0x10] sm:$0xff]  ;;  %vm132_vm1 = vcmask 261120   ;;  %s691_s17 = sshll.u32 %s1108_s9, 4  ;;  %s692_s17 = int_to_ptr.hbm [resolvable:$true] %s691_s17 }
   0x4   :  { %105 = vmatpush.msra.mxu0 %v33_v1  ;;  %v864_v4 = vld [vmem:[%s1103_s4 + $0x18] sm:$0xff]  ;;  %148 = vmatpush.msra.mxu1 %v859_v3  ;;  %v876_v6 = vld [vmem:[%s1103_s4 + $0x10] sm:$0xff]  ;;  %v881_v7 = vld [vmem:[%s1101_s2 + $0x8] sm:$0xff]  ;;  %vm682_vm3 = vcmask 33792  }
   0x5   :  { %700 = vmatmul.msk.f32.vlgmr.msra.gmra.mxu0 %vm65_vm0, %v54_v2  ;;  %171 = vmatpush.msra.mxu2 %v864_v4  ;;  %v886_v8 = vld [vmem:[%s1103_s4 + $0x8] sm:$0xff]  ;;  %v897_v10 = vld [vmem:[%s1101_s2] sm:$0xff]  ;;  %v56_v16 = vld [vmem:[%s1099_s0 + $0x10] sm:$0xff] }
   0x6   :  { %v55_v9 = vld [vmem:[%s1099_s0 + $0x8] sm:$0xff]  ;;  %149 = vmatpush.msra.mxu1 %v871_v5  ;;  %v902_v11 = vld [vmem:[%s1103_s4] sm:$0xff]  ;;  %v939_v17 = vld [vmem:[%s1104_s5 + $0x18] sm:$0xff] }
   0x7   :  { %172 = vmatpush.msra.mxu2 %v876_v6  ;;  %v919_v12 = vld [vmem:[%s1102_s3] ss:$0 sm:$0xff]  ;;  %195 = vmatpush.msra.mxu3 %v939_v17  ;;  %v945_v18 = vld [vmem:[%s1104_s5 + $0x10] sm:$0xff]  ;;  %v950_v19 = vld [vmem:[%s1104_s5 + $0x8] sm:$0xff] }
   0x8   :  { %150 = vmatpush.msra.mxu1 %v881_v7  ;;  %v956_v20 = vld [vmem:[%s1104_s5] sm:$0xff]  ;;  %v57_v30 = vld [vmem:[%s1099_s0 + $0x18] sm:$0xff]  ;;  %v59_v52 = vld [vmem:[%s1099_s0 + $0x28] sm:$0xff] }
   0x9   :  { %173 = vmatpush.msra.mxu2 %v886_v8  ;;  %196 = vmatpush.msra.mxu3 %v945_v18  ;;  %v968_v25 = vld [vmem:[%s1105_s6] ss:$0 sm:$0xff]  ;;  %v60_v63 = vld [vmem:[%s1099_s0 + $0x30] sm:$0xff] }
   0xa   :  { %151 = vmatpush.msra.mxu1 %v897_v10  ;;  %v58_v41 = vld [vmem:[%s1099_s0 + $0x20] sm:$0xff] }
   0xb   :  { %174 = vmatpush.msra.mxu2 %v902_v11  ;;  %197 = vmatpush.msra.mxu3 %v950_v19 }
   0xc   :  { %220 = vmatpush.msrb.mxu1 %v859_v3 }
   0xd   :  { %701 = vmatmul.msk.f32.gmra.mxu0 %vm65_vm0, %v55_v9  ;;  %240 = vmatpush.msrb.mxu2 %v864_v4 }
   0xe   :  { %221 = vmatpush.msrb.mxu1 %v871_v5  ;;  %198 = vmatpush.msra.mxu3 %v956_v20 }
   0xf   :  { %241 = vmatpush.msrb.mxu2 %v876_v6 }
  0x10   :  { %222 = vmatpush.msrb.mxu1 %v881_v7  ;;  %265 = vmatpush.msrb.mxu3 %v939_v17 }
  0x11   :  { %242 = vmatpush.msrb.mxu2 %v886_v8 }
  0x12   :  { %223 = vmatpush.msrb.mxu1 %v897_v10  ;;  %266 = vmatpush.msrb.mxu3 %v945_v18 }
  0x13   :  { %243 = vmatpush.msrb.mxu2 %v902_v11 }
  0x14   :  { %267 = vmatpush.msrb.mxu3 %v950_v19 }
  0x15   :  { %702 = vmatmul.msk.f32.gmra.mxu0 %vm65_vm0, %v56_v16 }
  0x16   :  { %268 = vmatpush.msrb.mxu3 %v956_v20 }
  0x1d   :  { %703 = vmatmul.msk.f32.gmra.mxu0 %vm65_vm0, %v57_v30 }
  0x25   :  { %704 = vmatmul.msk.f32.gmra.mxu0 %vm65_vm0, %v58_v41  ;;  %v676_v41 = vlaneseq }
  0x2d   :  { %705 = vmatmul.msk.f32.gmra.mxu0 %vm65_vm0, %v59_v52 }
  0x35   :  { %706 = vmatmul.msk.f32.gmra.mxu0 %vm65_vm0, %v60_v63 }
  0x82   :  { %v107_v13 = vpop.f32.mrf.mxu0 }
  0x83   :  { %v108_v14 = vadd.f32 %v919_v12, %v107_v13 }
  0x85   :  { %736 = vtanh.f32 %v108_v14 }
  0x8a   :  { %v110_v21 = vpop.f32.mrf.mxu0 }
  0x8b   :  { %v737_v15 = vpop.eup %736  ;;  %v111_v22 = vadd.f32 %v919_v12, %v110_v21 }
  0x8c   :  { %708 = vmatmul.msk.f32.vlgmr.msra.gmra.mxu1 %vm132_vm1, %v737_v15  ;;  %709 = vmatmul.msk.f32.vlgmr.msra.gmra.mxu2 %vm132_vm1, %v737_v15 }
  0x8d   :  { %290 = vmatpush.msra.mxu1 %v859_v3  ;;  %310 = vmatpush.msra.mxu2 %v864_v4 }
  0x8f   :  { %291 = vmatpush.msra.mxu1 %v871_v5  ;;  %311 = vmatpush.msra.mxu2 %v876_v6 }
  0x91   :  { %292 = vmatpush.msra.mxu1 %v881_v7  ;;  %312 = vmatpush.msra.mxu2 %v886_v8 }
  0x92   :  { %v113_v31 = vpop.f32.mrf.mxu0 }
  0x93   :  { %293 = vmatpush.msra.mxu1 %v897_v10  ;;  %313 = vmatpush.msra.mxu2 %v902_v11  ;;  %v114_v32 = vadd.f32 %v919_v12, %v113_v31 }
  0x9a   :  { %v116_v42 = vpop.f32.mrf.mxu0 }
  0x9b   :  { %v117_v43 = vadd.f32 %v919_v12, %v116_v42  ;;  %v677_v42 = vand.u32 127, %v676_v41 }
  0x9d   :  { %vm678_vm2 = vcmp.eq.s32.totalorder %v677_v42, 2 }
  0xa2   :  { %v119_v53 = vpop.f32.mrf.mxu0 }
  0xa3   :  { %v120_v54 = vadd.f32 %v919_v12, %v119_v53 }
  0xaa   :  { %v122_v0 = vpop.f32.mrf.mxu0 }
  0xab   :  { %v123_v1 = vadd.f32 %v919_v12, %v122_v0 }
 0x109   :  { %v153_v23 = vpop.f32.mrf.mxu1 }
 0x10a   :  { %v203_v24 = vadd.f32 %v153_v23, %v111_v22 }
 0x10c   :  { %738 = vtanh.f32 %v203_v24 }
 0x10f   :  { %v176_v26 = vpop.f32.mrf.mxu2 }
 0x110   :  { %v177_v27 = vadd.f32 %v968_v25, %v176_v26 }
 0x112   :  { %v739_v28 = vpop.eup %738  ;;  %740 = vtanh.f32 %v177_v27 }
 0x113   :  { %711 = vmatmul.msk.f32.vlgmr.msrb.gmra.mxu1 %vm132_vm1, %v739_v28  ;;  %712 = vmatmul.msk.f32.vlgmr.msrb.gmra.mxu2 %vm132_vm1, %v739_v28 }
 0x114   :  { %360 = vmatpush.msrb.mxu1 %v859_v3  ;;  %380 = vmatpush.msrb.mxu2 %v864_v4 }
 0x116   :  { %361 = vmatpush.msrb.mxu1 %v871_v5  ;;  %381 = vmatpush.msrb.mxu2 %v876_v6 }
 0x118   :  { %v741_v29 = vpop.eup %740  ;;  %362 = vmatpush.msrb.mxu1 %v881_v7  ;;  %382 = vmatpush.msrb.mxu2 %v886_v8 }
 0x119   :  { %710 = vmatmul.msk.f32.vlgmr.msra.gmra.mxu3 %vm132_vm1, %v741_v29 }
 0x11a   :  { %363 = vmatpush.msrb.mxu1 %v897_v10  ;;  %383 = vmatpush.msrb.mxu2 %v902_v11 }
 0x11b   :  { %335 = vmatpush.msra.mxu3 %v939_v17 }
 0x11d   :  { %336 = vmatpush.msra.mxu3 %v945_v18 }
 0x11f   :  { %337 = vmatpush.msra.mxu3 %v950_v19 }
 0x121   :  { %338 = vmatpush.msra.mxu3 %v956_v20 }
 0x190   :  { %v225_v33 = vpop.f32.mrf.mxu1 }
 0x191   :  { %v273_v34 = vadd.f32 %v225_v33, %v114_v32  ;;  %v52_v33 = vld [vmem:[%s1106_s7 + $0x18] sm:$0xff] }
 0x193   :  { %742 = vtanh.f32 %v273_v34  ;;  %v50_v34 = vld [vmem:[%s1106_s7 + $0x8] sm:$0xff] }
 0x196   :  { %v245_v35 = vpop.f32.mrf.mxu2 }
 0x197   :  { %v246_v37 = vadd.f32 %v968_v25, %v245_v35  ;;  %v49_v35 = vld [vmem:[%s1106_s7] sm:$0xff] }
 0x199   :  { %v743_v36 = vpop.eup %742 }
 0x19a   :  { %714 = vmatmul.msk.f32.vlgmr.msra.gmra.mxu1 %vm132_vm1, %v743_v36  ;;  %715 = vmatmul.msk.f32.vlgmr.msra.gmra.mxu2 %vm132_vm1, %v743_v36 }
 0x19b   :  { %430 = vmatpush.msra.mxu1 %v859_v3  ;;  %450 = vmatpush.msra.mxu2 %v864_v4 }
 0x19c   :  { %v200_v38 = vpop.f32.mrf.mxu3 }
 0x19d   :  { %v248_v39 = vadd.f32 %v246_v37, %v200_v38  ;;  %431 = vmatpush.msra.mxu1 %v871_v5  ;;  %451 = vmatpush.msra.mxu2 %v876_v6 }
 0x19f   :  { %744 = vtanh.f32 %v248_v39  ;;  %432 = vmatpush.msra.mxu1 %v881_v7  ;;  %452 = vmatpush.msra.mxu2 %v886_v8 }
 0x1a1   :  { %433 = vmatpush.msra.mxu1 %v897_v10  ;;  %453 = vmatpush.msra.mxu2 %v902_v11 }
 0x1a5   :  { %v745_v40 = vpop.eup %744 }
 0x1a6   :  { %713 = vmatmul.msk.f32.vlgmr.msrb.gmra.mxu3 %vm132_vm1, %v745_v40 }
 0x1a7   :  { %405 = vmatpush.msrb.mxu3 %v939_v17 }
 0x1a9   :  { %406 = vmatpush.msrb.mxu3 %v945_v18 }
 0x1ab   :  { %407 = vmatpush.msrb.mxu3 %v950_v19 }
 0x1ad   :  { %408 = vmatpush.msrb.mxu3 %v956_v20 }
 0x217   :  { %v295_v44 = vpop.f32.mrf.mxu1 }
 0x218   :  { %v343_v45 = vadd.f32 %v295_v44, %v117_v43  ;;  %v735_v43 = vld [vmem:[%s1107_s8] ss:$0 sm:$0xff] }
 0x21a   :  { %746 = vtanh.f32 %v343_v45  ;;  %v794_v45 = vmov -1.0  }
 0x21d   :  { %v315_v47 = vpop.f32.mrf.mxu2 }
 0x21e   :  { %v316_v48 = vadd.f32 %v968_v25, %v315_v47 }
 0x220   :  { %v747_v46 = vpop.eup %746 }
 0x221   :  { %717 = vmatmul.msk.f32.vlgmr.msrb.gmra.mxu1 %vm132_vm1, %v747_v46  ;;  %718 = vmatmul.msk.f32.vlgmr.msrb.gmra.mxu2 %vm132_vm1, %v747_v46  ;;  %v679_v46 = vsel %vm678_vm2, 0.0, %v794_v45 }
 0x222   :  { %500 = vmatpush.msrb.mxu1 %v859_v3  ;;  %520 = vmatpush.msrb.mxu2 %v864_v4 }
 0x224   :  { %501 = vmatpush.msrb.mxu1 %v871_v5  ;;  %521 = vmatpush.msrb.mxu2 %v876_v6 }
 0x226   :  { %502 = vmatpush.msrb.mxu1 %v881_v7  ;;  %522 = vmatpush.msrb.mxu2 %v886_v8 }
 0x228   :  { %503 = vmatpush.msrb.mxu1 %v897_v10  ;;  %523 = vmatpush.msrb.mxu2 %v902_v11 }
 0x229   :  { %v270_v49 = vpop.f32.mrf.mxu3 }
 0x22a   :  { %v318_v50 = vadd.f32 %v316_v48, %v270_v49 }
 0x22c   :  { %748 = vtanh.f32 %v318_v50 }
 0x232   :  { %v749_v51 = vpop.eup %748 }
 0x233   :  { %716 = vmatmul.msk.f32.vlgmr.msra.gmra.mxu3 %vm132_vm1, %v749_v51 }
 0x234   :  { %475 = vmatpush.msra.mxu3 %v939_v17 }
 0x236   :  { %476 = vmatpush.msra.mxu3 %v945_v18 }
 0x238   :  { %477 = vmatpush.msra.mxu3 %v950_v19 }
 0x23a   :  { %478 = vmatpush.msra.mxu3 %v956_v20 }
 0x29e   :  { %v365_v55 = vpop.f32.mrf.mxu1 }
 0x29f   :  { %v413_v56 = vadd.f32 %v365_v55, %v120_v54 }
 0x2a1   :  { %750 = vtanh.f32 %v413_v56 }
 0x2a4   :  { %v385_v58 = vpop.f32.mrf.mxu2 }
 0x2a5   :  { %v386_v59 = vadd.f32 %v968_v25, %v385_v58 }
 0x2a7   :  { %v751_v57 = vpop.eup %750 }
 0x2a8   :  { %720 = vmatmul.msk.f32.vlgmr.msra.gmra.mxu1 %vm132_vm1, %v751_v57  ;;  %721 = vmatmul.msk.f32.vlgmr.msra.gmra.mxu2 %vm132_vm1, %v751_v57 }
 0x2a9   :  { %570 = vmatpush.msra.mxu1 %v859_v3  ;;  %590 = vmatpush.msra.mxu2 %v864_v4 }
 0x2ab   :  { %571 = vmatpush.msra.mxu1 %v871_v5  ;;  %591 = vmatpush.msra.mxu2 %v876_v6 }
 0x2ad   :  { %572 = vmatpush.msra.mxu1 %v881_v7  ;;  %592 = vmatpush.msra.mxu2 %v886_v8 }
 0x2af   :  { %573 = vmatpush.msra.mxu1 %v897_v10  ;;  %593 = vmatpush.msra.mxu2 %v902_v11 }
 0x2b6   :  { %v340_v60 = vpop.f32.mrf.mxu3 }
 0x2b7   :  { %v388_v61 = vadd.f32 %v386_v59, %v340_v60 }
 0x2b9   :  { %752 = vtanh.f32 %v388_v61 }
 0x2bf   :  { %v753_v62 = vpop.eup %752 }
 0x2c0   :  { %719 = vmatmul.msk.f32.vlgmr.msrb.gmra.mxu3 %vm132_vm1, %v753_v62 }
 0x2c1   :  { %545 = vmatpush.msrb.mxu3 %v939_v17 }
 0x2c3   :  { %546 = vmatpush.msrb.mxu3 %v945_v18 }
 0x2c5   :  { %547 = vmatpush.msrb.mxu3 %v950_v19 }
 0x2c7   :  { %548 = vmatpush.msrb.mxu3 %v956_v20 }
 0x325   :  { %v435_v2 = vpop.f32.mrf.mxu1 }
 0x326   :  { %v483_v3 = vadd.f32 %v435_v2, %v123_v1 }
 0x328   :  { %754 = vtanh.f32 %v483_v3 }
 0x32b   :  { %v455_v7 = vpop.f32.mrf.mxu2 }
 0x32c   :  { %v456_v9 = vadd.f32 %v968_v25, %v455_v7 }
 0x32e   :  { %v755_v5 = vpop.eup %754 }
 0x32f   :  { %723 = vmatmul.msk.f32.vlgmr.msrb.gmra.mxu1 %vm132_vm1, %v755_v5  ;;  %724 = vmatmul.msk.f32.vlgmr.msrb.gmra.mxu2 %vm132_vm1, %v755_v5 }
 0x330   :  { %640 = vmatpush.msrb.mxu1 %v864_v4  ;;  %v61_v4 = vld [vmem:[%s1099_s0 + $0x38] sm:$0xff]  ;;  %668 = vmatpush.msrb.mxu2 %v52_v33 }
 0x331   :  { %707 = vmatmul.msk.f32.gmra.mxu0 %vm65_vm0, %v61_v4 }
 0x332   :  { %641 = vmatpush.msrb.mxu1 %v876_v6  ;;  %v125_v6 = vpop.f32.mrf.mxu0 }
 0x334   :  { %642 = vmatpush.msrb.mxu1 %v886_v8  ;;  %v126_v8 = vadd.f32 %v919_v12, %v125_v6 }
 0x336   :  { %643 = vmatpush.msrb.mxu1 %v902_v11 }
 0x343   :  { %v410_v10 = vpop.f32.mrf.mxu3 }
 0x344   :  { %v458_v13 = vadd.f32 %v456_v9, %v410_v10 }
 0x346   :  { %756 = vtanh.f32 %v458_v13 }
 0x34c   :  { %v757_v14 = vpop.eup %756 }
 0x34d   :  { %722 = vmatmul.msk.f32.vlgmr.msra.gmra.mxu3 %vm132_vm1, %v757_v14 }
 0x34e   :  { %615 = vmatpush.msra.mxu3 %v939_v17 }
 0x350   :  { %616 = vmatpush.msra.mxu3 %v945_v18 }
 0x352   :  { %617 = vmatpush.msra.mxu3 %v950_v19 }
 0x354   :  { %618 = vmatpush.msra.mxu3 %v956_v20 }
 0x3ac   :  { %v505_v11 = vpop.f32.mrf.mxu1 }
 0x3ad   :  { %v553_v15 = vadd.f32 %v505_v11, %v126_v8 }
 0x3ae   :  { %v128_v22 = vpop.f32.mrf.mxu0 }
 0x3af   :  { %758 = vtanh.f32 %v553_v15  ;;  %v129_v23 = vadd.f32 %v919_v12, %v128_v22  ;;  %v51_v12 = vld [vmem:[%s1106_s7 + $0x10] sm:$0xff]  ;;  %s795_s7 = smov [#allocation2]  }
 0x3b0   :  { %669 = vmatpush.msrb.mxu2 %v51_v12  ;;  %s689_s14 = sshll.u32 %s795_s7, 4  ;;  %s690_s14 = int_to_ptr.vmem [resolvable:$true] %s689_s14 }
 0x3b2   :  { %v525_v17 = vpop.f32.mrf.mxu2  ;;  %670 = vmatpush.msrb.mxu2 %v50_v34 }
 0x3b3   :  { %v526_v18 = vadd.f32 %v968_v25, %v525_v17 }
 0x3b4   :  { %671 = vmatpush.msrb.mxu2 %v49_v35 }
 0x3b5   :  { %v759_v16 = vpop.eup %758 }
 0x3b6   :  { %726 = vmatmul.msk.f32.vlgmr.msra.gmra.mxu1 %vm132_vm1, %v759_v16  ;;  %727 = vmatmul.msk.f32.vlgmr.msra.gmra.mxu2 %vm132_vm1, %v759_v16 }
 0x3d0   :  { %v480_v19 = vpop.f32.mrf.mxu3 }
 0x3d1   :  { %v528_v20 = vadd.f32 %v526_v18, %v480_v19 }
 0x3d3   :  { %760 = vtanh.f32 %v528_v20 }
 0x3d9   :  { %v761_v21 = vpop.eup %760 }
 0x3da   :  { %725 = vmatmul.msk.f32.vlgmr.msrb.gmra.mxu3 %vm132_vm1, %v761_v21 }
 0x433   :  { %v575_v24 = vpop.f32.mrf.mxu1 }
 0x434   :  { %v623_v26 = vadd.f32 %v575_v24, %v129_v23 }
 0x436   :  { %762 = vtanh.f32 %v623_v26 }
 0x439   :  { %v595_v28 = vpop.f32.mrf.mxu2 }
 0x43a   :  { %v596_v29 = vadd.f32 %v968_v25, %v595_v28 }
 0x43c   :  { %v763_v27 = vpop.eup %762 }
 0x43d   :  { %729 = vmatmul.msk.f32.vlgmr.msrb.gmra.mxu1 %vm132_vm1, %v763_v27 }
 0x45d   :  { %v550_v30 = vpop.f32.mrf.mxu3 }
 0x45e   :  { %v598_v31 = vadd.f32 %v596_v29, %v550_v30 }
 0x460   :  { %764 = vtanh.f32 %v598_v31 }
 0x466   :  { %v765_v32 = vpop.eup %764 }
 0x467   :  { %728 = vmatmul.msk.f32.vlgmr.msra.gmra.mxu3 %vm132_vm1, %v765_v32 }
 0x4ba   :  { %v645_v36 = vpop.f32.mrf.mxu1 }
 0x4bb   :  { %v646_v37 = vadd.f32 %v968_v25, %v645_v36 }
 0x4ea   :  { %v620_v38 = vpop.f32.mrf.mxu3 }
 0x4eb   :  { %v648_v39 = vadd.f32 %v646_v37, %v620_v38 }
 0x4ed   :  { %766 = vtanh.f32 %v648_v39 }
 0x4f3   :  { %v767_v40 = vpop.eup %766 }
 0x4f4   :  { %730 = vmatmul.msk.f32.vlgmr.msrb.gmra.mxu2 %vm132_vm1, %v767_v40 }
 0x577   :  { %v673_v44 = vpop.f32.mrf.mxu2 }
 0x578   :  { %v674_v47 = vadd.f32 %v735_v43, %v673_v44 }
 0x57a   :  { %v680_v25 = vmax.f32 %v679_v46, %v674_v47 }
 0x57c   :  { %v681_v48 = vmin.f32 %v680_v25, 1.0 }
 0x57e   :  { %683 = vst.msk [vmem:[#allocation2] sm:$0x3] %vm682_vm3, %v681_v48 }
 0x57f   :  { %694 = dma.vmem_to_hbm [thread:$0]  %s690_s14, 32, %s692_s17, [#allocation3]  }
 0x580   :  { %792 = dma.done.wait [#allocation3], 32  }
 0x581   :  { %793 = vsyncadd [#allocation3], 4294967264 }
 0x582   :  { %699 = vsyncpa [#allocation3], 1 }

</bundles_post_ra>
